<compile_context>
chip_gen: v7x
topology: tpu7x:2x2x1
jax: 0.10.0
libtpu: 0.0.40
codegen_flags: <defaults>
</compile_context>

<pallas_src>
import jax
import jax.numpy as jnp
from jax import lax
from jax.experimental import pallas as pl
from jax.experimental.pallas import tpu as pltpu

TEMPERATURE = 4.0  # distillation temperature (module defines no parameters)


def _sublane_multiple(dtype) -> int:
    itemsize = jnp.dtype(dtype).itemsize
    return {4: 8, 2: 16, 1: 32}.get(itemsize, 8)


def _vmem_capacity_bytes() -> int:
    try:
        return int(pltpu.get_tpu_info().vmem_capacity_bytes)
    except Exception:
        return 64 << 20  # conservative fallback (v7x per-core VMEM)


def _round_up(x: int, m: int) -> int:
    return -(-x // m) * m


def _choose_block_rows(batch: int, classes: int, dtype) -> int:
    """Generation-aware batch-tile rows.

    Budget ~50% of VMEM for the 2 streamed inputs x 2 pipeline buffers plus the
    fused kernel's f32 [TB,C] temporaries, rounded to the dtype sublane
    multiple.  Also ensure >= 2 grid steps when possible so the 'parallel'
    batch axis can shard across v7x's two TensorCores.
    """
    itemsize = jnp.dtype(dtype).itemsize
    sub = _sublane_multiple(dtype)
    vmem_cap = _vmem_capacity_bytes()

    # streamed inputs (2 arrays x 2 pipeline buffers) + ~6 live f32 [TB,C] temps
    bytes_per_row = classes * (4 * itemsize + 6 * 4)
    budget = vmem_cap // 2
    rows = budget // max(1, bytes_per_row)
    tb = max(sub, (rows // sub) * sub)

    # megacore: prefer at least 2 grid steps so both TensorCores get work.
    half = _round_up(max(1, -(-batch // 2)), sub)
    tb = min(tb, max(sub, half))

    # never larger than the (sublane-rounded) batch.
    return min(tb, _round_up(max(batch, 1), sub))


def _make_kernel(batch: int, block_rows: int, inv_temp: float, need_mask: bool):
    def kernel(t_ref, s_ref, out_ref):
        t = t_ref[...].astype(jnp.float32) * inv_temp   # [TB, C]
        s = s_ref[...].astype(jnp.float32) * inv_temp   # [TB, C]

        # stable shifted logits
        t_shift = t - jnp.max(t, axis=-1, keepdims=True)
        s_shift = s - jnp.max(s, axis=-1, keepdims=True)

        t_exp = jnp.exp(t_shift)                                        # [TB, C]
        t_sum = jnp.sum(t_exp, axis=-1, keepdims=True)                  # [TB, 1]
        s_sum = jnp.sum(jnp.exp(s_shift), axis=-1, keepdims=True)       # [TB, 1]

        # Fused KL(p_t || p_s) per row (since sum_c p_t == 1):
        #   KL_row = (1/t_sum) * sum_c[t_exp*(t_shift - s_shift)]
        #            - (log t_sum - log s_sum)
        inner = jnp.sum(t_exp * (t_shift - s_shift), axis=-1, keepdims=True)
        kl_rows = (inner * pl.reciprocal(t_sum, approx=True)
                   - (jnp.log(t_sum) - jnp.log(s_sum)))                 # [TB, 1]

        if need_mask:
            # ragged last tile: rows >= (batch - i*TB) are garbage -> zero them
            i = pl.program_id(0)
            valid = batch - i * block_rows
            row_ids = lax.broadcasted_iota(jnp.int32, kl_rows.shape, 0)
            kl_rows = jnp.where(row_ids < valid, kl_rows, 0.0)

        kl_tile = jnp.sum(kl_rows, axis=0, keepdims=True)               # [1, 1]
        out_ref[...] = jnp.broadcast_to(kl_tile, out_ref.shape)

    return kernel


def distill_loss(teacher_logits, student_logits, *, temperature=TEMPERATURE,
                 block_rows=None):
    """Temperature-scaled distillation KL loss (batchmean reduction).

    Accepts f32 or bf16 logits of shape [batch, classes]; math is done in f32
    inside the kernel (bf16 inputs halve HBM traffic for this bandwidth-bound
    loss, the biggest win on v5e).
    """
    assert teacher_logits.shape == student_logits.shape
    assert teacher_logits.ndim == 2, "expected [batch, classes] logits"
    b, c = teacher_logits.shape
    dtype = teacher_logits.dtype
    itemsize = jnp.dtype(dtype).itemsize
    sub = _sublane_multiple(dtype)

    if block_rows is None:
        tb = _choose_block_rows(b, c, dtype)
    else:
        tb = max(sub, _round_up(int(block_rows), sub))

    num_tiles = pl.cdiv(b, tb)
    need_mask = (b % tb) != 0

    # VMEM limit from the actual fused-kernel footprint (+ headroom), capped
    # well below physical capacity (important on v7x's 64 MiB).
    vmem_cap = _vmem_capacity_bytes()
    streamed = 4 * tb * c * itemsize      # 2 inputs x 2 pipeline buffers
    temps = 6 * tb * c * 4                # live f32 [TB,C] intermediates
    vmem_limit = streamed + temps + (4 << 20)
    vmem_limit = int(max(16 << 20, min(vmem_limit, int(vmem_cap * 0.75))))

    kernel = _make_kernel(b, tb, float(1.0 / temperature), need_mask)

    cost = pl.CostEstimate(
        flops=10 * b * c,
        transcendentals=2 * b * c,
        bytes_accessed=2 * b * c * itemsize + num_tiles * 8 * 128 * 4,
    )

    partials = pl.pallas_call(
        kernel,
        out_shape=jax.ShapeDtypeStruct((num_tiles * 8, 128), jnp.float32),
        grid=(num_tiles,),
        in_specs=[
            pl.BlockSpec((tb, c), lambda i: (i, 0)),
            pl.BlockSpec((tb, c), lambda i: (i, 0)),
        ],
        out_specs=pl.BlockSpec((8, 128), lambda i: (i, 0)),
        compiler_params=pltpu.CompilerParams(
            dimension_semantics=("parallel",),
            vmem_limit_bytes=vmem_limit,
        ),
        cost_estimate=cost,
    )(teacher_logits, student_logits)

    # TODO(synk): for vocab-scale C add a second ("arbitrary") grid axis over
    # classes with an online softmax so a full row need not fit one VMEM tile.

    kl_sum = jnp.sum(partials.reshape(num_tiles, 8, 128)[:, 0, 0])
    # batchmean (over the ORIGINAL batch) + T^2 scaling (Hinton distillation)
    return kl_sum * (temperature * temperature) / b


if __name__ == "__main__":
    # TODO(synk): original forward() only unpacks data and calls pdb.set_trace();
    # a debugger breakpoint has no Pallas equivalent, so the canonical KD loss
    # hot path is implemented instead.
    key = jax.random.PRNGKey(0)
    k1, k2, k3, k4, k5, k6 = jax.random.split(key, 6)

    def ref(t, s):
        lt = jax.nn.log_softmax(t.astype(jnp.float32) / TEMPERATURE, axis=-1)
        ls = jax.nn.log_softmax(s.astype(jnp.float32) / TEMPERATURE, axis=-1)
        return jnp.sum(jnp.exp(lt) * (lt - ls)) * TEMPERATURE**2 / t.shape[0]

    # Case 1: small demo shape, auto tile sizing (single tile).
    B, C = 8, 32
    teacher = jax.random.normal(k1, (B, C), dtype=jnp.float32)
    student = jax.random.normal(k2, (B, C), dtype=jnp.float32)
    loss = distill_loss(teacher, student)
    jax.block_until_ready(loss)
    assert jnp.allclose(loss, ref(teacher, student), rtol=5e-3, atol=1e-5), (
        loss, ref(teacher, student))

    # Case 2: exercises the multi-tile grid + ragged-last-tile masking
    # (B=20, tb=16 -> 2 tiles, last tile has 4 valid rows, no jnp.pad copy).
    B2, C2 = 20, 128
    teacher2 = jax.random.normal(k3, (B2, C2), dtype=jnp.float32)
    student2 = jax.random.normal(k4, (B2, C2), dtype=jnp.float32)
    loss2 = distill_loss(teacher2, student2, block_rows=16)
    jax.block_until_ready(loss2)
    assert jnp.allclose(loss2, ref(teacher2, student2), rtol=5e-3, atol=1e-5), (
        loss2, ref(teacher2, student2))

    # Case 3: bf16 logits (sublane multiple 16) + ragged tile.
    B3, C3 = 24, 256
    teacher3 = jax.random.normal(k5, (B3, C3), dtype=jnp.float32).astype(jnp.bfloat16)
    student3 = jax.random.normal(k6, (B3, C3), dtype=jnp.float32).astype(jnp.bfloat16)
    loss3 = distill_loss(teacher3, student3, block_rows=16)
    jax.block_until_ready(loss3)
    assert jnp.allclose(loss3, ref(teacher3, student3), rtol=2e-2, atol=1e-4), (
        loss3, ref(teacher3, student3))

    print("KERNEL_OK")
</pallas_src>

<mosaic_0001>
module attributes {stable_mosaic.version = 11 : i64} {
  func.func @kernel(%arg0: i32, %arg1: memref<8x32xf32, #tpu.memory_space<vmem>>, %arg2: memref<8x32xf32, #tpu.memory_space<vmem>>, %arg3: memref<8x128xf32, #tpu.memory_space<vmem>>) attributes {dimension_semantics = [#tpu.dimension_semantics<parallel>], iteration_bounds = array<i64: 1>, scalar_prefetch = 0 : i64, scratch_operands = 0 : i64, tpu.core_type = #tpu.core_type<tc>, window_params = [{transform_indices = @transform_0, window_bounds = array<i64: 8, 32>}, {transform_indices = @transform_1, window_bounds = array<i64: 8, 32>}, {transform_indices = @transform_2, window_bounds = array<i64: 8, 128>}]} {
    %c0 = arith.constant 0 : index
    %c0_0 = arith.constant 0 : index
    %0 = vector.load %arg1[%c0, %c0_0] : memref<8x32xf32, #tpu.memory_space<vmem>>, vector<8x32xf32>
    %cst = arith.constant 2.500000e-01 : f32
    %1 = vector.broadcast %cst : f32 to vector<8x32xf32>
    %2 = arith.mulf %0, %1 : vector<8x32xf32>
    %c0_1 = arith.constant 0 : index
    %c0_2 = arith.constant 0 : index
    %3 = vector.load %arg2[%c0_1, %c0_2] : memref<8x32xf32, #tpu.memory_space<vmem>>, vector<8x32xf32>
    %cst_3 = arith.constant 2.500000e-01 : f32
    %4 = vector.broadcast %cst_3 : f32 to vector<8x32xf32>
    %5 = arith.mulf %3, %4 : vector<8x32xf32>
    %cst_4 = arith.constant dense<0xFF800000> : vector<8xf32>
    %6 = vector.multi_reduction <maximumf>, %2, %cst_4 [1] : vector<8x32xf32> to vector<8xf32>
    %7 = vector.shape_cast %6 : vector<8xf32> to vector<8x1xf32>
    %8 = vector.broadcast %7 : vector<8x1xf32> to vector<8x32xf32>
    %9 = arith.subf %2, %8 : vector<8x32xf32>
    %cst_5 = arith.constant dense<0xFF800000> : vector<8xf32>
    %10 = vector.multi_reduction <maximumf>, %5, %cst_5 [1] : vector<8x32xf32> to vector<8xf32>
    %11 = vector.shape_cast %10 : vector<8xf32> to vector<8x1xf32>
    %12 = vector.broadcast %11 : vector<8x1xf32> to vector<8x32xf32>
    %13 = arith.subf %5, %12 : vector<8x32xf32>
    %14 = math.exp %9 : vector<8x32xf32>
    %cst_6 = arith.constant dense<0.000000e+00> : vector<8xf32>
    %15 = vector.multi_reduction <add>, %14, %cst_6 [1] : vector<8x32xf32> to vector<8xf32>
    %16 = vector.shape_cast %15 : vector<8xf32> to vector<8x1xf32>
    %17 = math.exp %13 : vector<8x32xf32>
    %cst_7 = arith.constant dense<0.000000e+00> : vector<8xf32>
    %18 = vector.multi_reduction <add>, %17, %cst_7 [1] : vector<8x32xf32> to vector<8xf32>
    %19 = vector.shape_cast %18 : vector<8xf32> to vector<8x1xf32>
    %20 = arith.subf %9, %13 : vector<8x32xf32>
    %21 = arith.mulf %14, %20 : vector<8x32xf32>
    %cst_8 = arith.constant dense<0.000000e+00> : vector<8xf32>
    %22 = vector.multi_reduction <add>, %21, %cst_8 [1] : vector<8x32xf32> to vector<8xf32>
    %23 = vector.shape_cast %22 : vector<8xf32> to vector<8x1xf32>
    %24 = tpu.reciprocal %16 {approx = true} : vector<8x1xf32> -> vector<8x1xf32>
    %25 = arith.mulf %23, %24 : vector<8x1xf32>
    %26 = math.log %16 : vector<8x1xf32>
    %27 = math.log %19 : vector<8x1xf32>
    %28 = arith.subf %26, %27 : vector<8x1xf32>
    %29 = arith.subf %25, %28 : vector<8x1xf32>
    %cst_9 = arith.constant dense<0.000000e+00> : vector<1xf32>
    %30 = vector.multi_reduction <add>, %29, %cst_9 [0] : vector<8x1xf32> to vector<1xf32>
    %31 = vector.shape_cast %30 : vector<1xf32> to vector<1x1xf32>
    %32 = vector.shape_cast %31 : vector<1x1xf32> to vector<1x1xf32>
    %33 = vector.broadcast %32 : vector<1x1xf32> to vector<8x128xf32>
    %c0_10 = arith.constant 0 : index
    %c0_11 = arith.constant 0 : index
    %34 = vector.load %arg3[%c0_10, %c0_11] : memref<8x128xf32, #tpu.memory_space<vmem>>, vector<8x128xf32>
    tpu.vector_store %arg3[%c0_10, %c0_11], %33 {strides = array<i32>} : memref<8x128xf32, #tpu.memory_space<vmem>>, vector<8x128xf32>,
    return
  }
  func.func @transform_0(%arg0: i32) -> (i32, i32) {
    %c0_i32 = arith.constant 0 : i32
    %c0_i32_0 = arith.constant 0 : i32
    return %arg0, %c0_i32 : i32, i32
  }
  func.func @transform_1(%arg0: i32) -> (i32, i32) {
    %c0_i32 = arith.constant 0 : i32
    %c0_i32_0 = arith.constant 0 : i32
    return %arg0, %c0_i32 : i32, i32
  }
  func.func @transform_2(%arg0: i32) -> (i32, i32) {
    %c0_i32 = arith.constant 0 : i32
    %c0_i32_0 = arith.constant 0 : i32
    return %arg0, %c0_i32 : i32, i32
  }
}

</mosaic_0001>

<bundles_post_ra>
// kernel: tpu_custom_call.1
= control target key start
LH: loop header
LB: loop body
LE: loop exit
PB: predicated region body
PF: predicated region fallthrough
CT: control target
= control target key end

     0   :  { %7 = vsyncpa [#allocation3], 0  ;;  %s239_s0 = inlined_call_operand.hbm [shape: f32[8,32], index: 0, kind: input, shape index: {}]   ;;  %s240_s1 = inlined_call_operand.hbm [shape: f32[8,32], index: 1, kind: input, shape index: {}]   ;;  %s241_s2 = inlined_call_operand.hbm [shape: f32[8,128], index: 2, kind: output, shape index: {}]  }
   0x1   :  { %8 = vsyncpa [#allocation6], 0 }
   0x2   :  { %9 = vsyncpa [#allocation4], 0  ;;  %s180_s9 = smov [#allocation2]   ;;  %s181_s11 = smov [#allocation5]  }
   0x3   :  { %s16_s10 = sshll.u32 %s180_s9, 4  ;;  %s26_s12 = sshll.u32 %s181_s11, 4  ;;  %s17_s10 = int_to_ptr.vmem [resolvable:$true] %s16_s10  ;;  %s27_s12 = int_to_ptr.vmem [resolvable:$true] %s26_s12 }
   0x4   :  { %s108_s15 = scalar_lea.hbm %s239_s0, 128 }
   0x5   :  { %p109_p0 = scmp.ne.s32.totalorder %s239_s0, %s108_s15  ;;  %p112_p1 = scmp.lt.u32.totalorder %s108_s15, %s239_s0 }
   0x7   :  { %p114_p2 = pnand %p112_p1, %p109_p0 }
   0x9   :  { %117 = shalt.err (!%p114_p2)
}
   0xa   :  { %s118_s20 = scalar_lea.vmem %s17_s10, 128  ;;  %p123_p4 = scmp.lt.s32.totalorder %s17_s10, %s17_s10 }
   0xb   :  { %p119_p3 = scmp.ne.s32.totalorder %s17_s10, %s118_s20  ;;  %p124_p5 = scmp.lt.s32.totalorder %s118_s20, %s118_s20 }
   0xd   :  { %p125_p6 = por %p124_p5, %p123_p4 }
   0xf   :  { %p126_p7 = pnand %p125_p6, %p119_p3 }
  0x11   :  { %129 = shalt.err (!%p126_p7)
}
  0x12   :  { %19 = dma.hbm_to_vmem [thread:$0]  %s239_s0, 128, %s17_s10, [#allocation3]  }
  0x13   :  { %s130_s25 = scalar_lea.hbm %s240_s1, 128 }
  0x14   :  { %p131_p8 = scmp.ne.s32.totalorder %s240_s1, %s130_s25  ;;  %p134_p9 = scmp.lt.u32.totalorder %s130_s25, %s240_s1 }
  0x16   :  { %p136_p10 = pnand %p134_p9, %p131_p8 }
  0x18   :  { %139 = shalt.err (!%p136_p10)
}
  0x19   :  { %s140_s30 = scalar_lea.vmem %s27_s12, 128  ;;  %p145_p12 = scmp.lt.s32.totalorder %s27_s12, %s27_s12 }
  0x1a   :  { %p141_p11 = scmp.ne.s32.totalorder %s27_s12, %s140_s30  ;;  %p146_p13 = scmp.lt.s32.totalorder %s140_s30, %s140_s30 }
  0x1c   :  { %p147_p0 = por %p146_p13, %p145_p12 }
  0x1e   :  { %p148_p1 = pnand %p147_p0, %p141_p11 }
  0x20   :  { %151 = shalt.err (!%p148_p1)
}
  0x21   :  { %29 = dma.hbm_to_vmem [thread:$0]  %s240_s1, 128, %s27_s12, [#allocation6]  }
  0x22   :  { %174 = dma.done.wait [#allocation3], 128  }
  0x23   :  { %175 = vsyncadd [#allocation3], 4294967168 }
  0x24   :  { %176 = dma.done.wait [#allocation6], 128  }
  0x25   :  { %177 = vsyncadd [#allocation6], 4294967168  ;;  %v36_v0 = vld [vmem:[#allocation2] sm:$0xff]  ;;  %vm40_vm0 = vcmask 261120   ;;  %v38_v1 = vld [vmem:[#allocation5] sm:$0xff]  ;;  %s182_s1 = smov [#allocation7]  }
  0x26   :  { %v37_v2 = vmul.f32 0.25, %v36_v0  ;;  %v39_v3 = vmul.f32 0.25, %v38_v1  ;;  %s85_s4 = sshll.u32 %s182_s1, 4  ;;  %s86_s4 = int_to_ptr.vmem [resolvable:$true] %s85_s4 }
  0x27   :  { %s152_s5 = scalar_lea.vmem %s86_s4, 128  ;;  %p157_p3 = scmp.lt.s32.totalorder %s86_s4, %s86_s4 }
  0x28   :  { %v41_v4 = vsel %vm40_vm0, %v37_v2, -inf  ;;  %v45_v5 = vsel %vm40_vm0, %v39_v3, -inf  ;;  %p153_p2 = scmp.ne.s32.totalorder %s86_s4, %s152_s5  ;;  %p158_p4 = scmp.lt.s32.totalorder %s152_s5, %s152_s5 }
  0x29   :  { %42 = vmax.xlane.f32.xlu0 %v41_v4 }
  0x2a   :  { %p159_p5 = por %p158_p4, %p157_p3 }
  0x2c   :  { %p160_p6 = pnand %p159_p5, %p153_p2 }
  0x2d   :  { %46 = vmax.xlane.f32.xlu0 %v45_v5 }
  0xb6   :  { %v43_v6 = vpop.xlane.xlu0 %42 }
  0xb7   :  { %v44_v7 = vsub.f32 %v37_v2, %v43_v6 }
  0xb9   :  { %v49_v8 = vmul.f32 1.442695, %v44_v7 }
  0xba   :  { %v47_v9 = vpop.xlane.xlu0 %46 }
  0xbb   :  { %98 = vpow2.f32 %v49_v8  ;;  %v48_v10 = vsub.f32 %v39_v3, %v47_v9 }
  0xbd   :  { %v54_v11 = vmul.f32 1.442695, %v48_v10  ;;  %v59_v12 = vsub.f32 %v44_v7, %v48_v10 }
  0xbf   :  { %100 = vpow2.f32 %v54_v11 }
  0xc5   :  { %v99_v13 = vpop.eup %98 }
  0xc6   :  { %v51_v14 = vsel %vm40_vm0, %v99_v13, 0.0  ;;  %v60_v15 = vmul.f32 %v99_v13, %v59_v12 }
  0xc7   :  { %52 = vadd.xlane.f32.xlu1 %v51_v14 }
  0xc8   :  { %v61_v16 = vsel %vm40_vm0, %v60_v15, 0.0 }
  0xc9   :  { %v101_v17 = vpop.eup %100  ;;  %62 = vadd.xlane.f32.xlu0 %v61_v16 }
  0xca   :  { %v56_v18 = vsel %vm40_vm0, %v101_v17, 0.0 }
  0xcb   :  { %57 = vadd.xlane.f32.xlu1 %v56_v18 }
 0x154   :  { %v53_v19 = vpop.xlane.xlu1 %52 }
 0x155   :  { %102 = vlog2.f32 %v53_v19 }
 0x156   :  { %104 = vrcp.f32 %v53_v19  ;;  %v63_v26 = vpop.xlane.xlu0 %62 }
 0x158   :  { %v58_v20 = vpop.xlane.xlu1 %57 }
 0x159   :  { %106 = vlog2.f32 %v58_v20 }
 0x15f   :  { %v103_v21 = vpop.eup %102 }
 0x160   :  { %v105_v22 = vpop.eup %104  ;;  %v67_v24 = vmul.f32 0.6931472, %v103_v21 }
 0x161   :  { %v65_v27 = vmul.f32 %v105_v22, %v63_v26 }
 0x163   :  { %v107_v23 = vpop.eup %106 }
 0x164   :  { %v69_v25 = vmul.f32 0.6931472, %v107_v23 }
 0x166   :  { %v70_v28 = vsub.f32 %v67_v24, %v69_v25 }
 0x168   :  { %v71_v29 = vsub.f32 %v65_v27, %v70_v28 }
 0x16a   :  { %v72_v30 = vrot.slane %v71_v29, 4 }
 0x16c   :  { %v73_v31 = vadd.f32 %v72_v30, %v71_v29 }
 0x16e   :  { %v74_v32 = vrot.slane %v73_v31, 2 }
 0x170   :  { %v75_v33 = vadd.f32 %v74_v32, %v73_v31 }
 0x172   :  { %v76_v34 = vrot.slane %v75_v33, 1 }
 0x174   :  { %v77_v35 = vadd.f32 %v76_v34, %v75_v33 }
 0x176   :  { %78 = vst [vmem:[#allocation7] sm:$0xff] %v77_v35 }
 0x177   :  { %163 = shalt.err (!%p160_p6)
}
 0x178   :  { %s164_s8 = scalar_lea.hbm %s241_s2, 128 }
 0x179   :  { %p165_p7 = scmp.ne.s32.totalorder %s241_s2, %s164_s8  ;;  %p168_p8 = scmp.lt.u32.totalorder %s164_s8, %s241_s2 }
 0x17b   :  { %p170_p9 = pnand %p168_p8, %p165_p7 }
 0x17d   :  { %173 = shalt.err (!%p170_p9)
}
 0x17e   :  { %88 = dma.vmem_to_hbm [thread:$0]  %s86_s4, 128, %s241_s2, [#allocation4]  }
 0x17f   :  { %178 = dma.done.wait [#allocation4], 128  }
 0x180   :  { %179 = vsyncadd [#allocation4], 4294967168 }
 0x181   :  { %92 = vsyncpa [#allocation3], 1 }
 0x182   :  { %93 = vsyncpa [#allocation6], 1 }
 0x183   :  { %94 = vsyncpa [#allocation4], 1 }

</bundles_post_ra>
